<compile_context>
chip_gen: v6e
topology: v6e:2x2x1
jax: 0.10.0
libtpu: 0.0.40
codegen_flags: <defaults>
</compile_context>

<pallas_src>
import jax
import jax.numpy as jnp
from jax.experimental import pallas as pl
from jax.experimental.pallas import tpu as pltpu


# ----------------------------------------------------------------------------
# Fused kernel:
#   frames (B*T, L) bf16  --(bf16 MXU, f32 acc)-->  h = relu(frames@w_fused+b1)
#   pooled = pool @ h            (B, H)   (pool = block-diag 1/T, precomputed)
#   emb    = pooled @ w2 + b2    (B, E)
#   score  = [threshold, cos(emb, x_e_normalized)]   (B, 2)
# ----------------------------------------------------------------------------
def make_fused_kernel(threshold):
    threshold = float(threshold)

    def fused_kernel(frames_ref, wf_ref, b1_ref, pool_ref, w2_ref, b2_ref,
                     xen_ref, out_ref):
        # --- fused feat-extractor + trunk layer: single bf16 MXU matmul ---
        h = jnp.dot(frames_ref[...], wf_ref[...],
                    preferred_element_type=jnp.float32)              # (BT, H)
        h = jnp.maximum(h + b1_ref[...], 0.0)                        # f32

        # --- per-utterance mean pooling over T frames (precomputed matrix) ---
        pooled = jnp.dot(pool_ref[...], h,
                         preferred_element_type=jnp.float32)         # (B, H)

        # --- embedding head ---
        emb = jnp.dot(pooled, w2_ref[...],
                      preferred_element_type=jnp.float32) + b2_ref[...]  # (B, E)

        # --- cosine scoring (hyperion l2_norm: x / (||x|| + 1e-10)) ---
        ss = jnp.sum(emb * emb, axis=-1, keepdims=True)              # (B, 1)
        inv = pl.reciprocal(jnp.sqrt(ss) + 1e-10, approx=True)       # EUP slot
        xt_n = emb * inv                                             # (B, E)
        tar = jnp.sum(xen_ref[...] * xt_n, axis=-1, keepdims=True)   # (B, 1)

        # direct column stores (no lane-axis concat)
        out_ref[:, 0:1] = threshold + 0.0 * tar                      # non_score
        out_ref[:, 1:2] = tar                                        # tar_score

    return fused_kernel


def cosine_scoring_fused(frames, w_fused, b1, pool, w2, b2, xe_n, threshold, B):
    """Single fused pallas_call covering the whole forward pass."""
    vmem = pl.BlockSpec(memory_space=pltpu.MemorySpace.VMEM)
    return pl.pallas_call(
        make_fused_kernel(threshold),
        out_shape=jax.ShapeDtypeStruct((B, 2), jnp.float32),
        in_specs=[vmem,   # frames (B*T, L)  bf16
                  vmem,   # w_fused (L, H)   bf16
                  vmem,   # b1      (1, H)   f32
                  vmem,   # pool    (B, B*T) f32 (block-diag 1/T, trace-time)
                  vmem,   # w2      (H, E)   f32
                  vmem,   # b2      (1, E)   f32
                  vmem],  # xe_n    (1, E)   f32 (pre-normalized enrollment)
        out_specs=vmem,
        compiler_params=pltpu.CompilerParams(
            vmem_limit_bytes=32 * 1024 * 1024),
    )(frames, w_fused, b1, pool, w2, b2, xe_n)


# ----------------------------------------------------------------------------
# MyModel wrapper (mirrors the PyTorch forward)
# ----------------------------------------------------------------------------
class MyModelPallas:
    def __init__(self, params, x_e, threshold=0.0):
        L = params["frame_len"]
        # Exact algebraic fusion: no nonlinearity between feat_extractor and
        # the first trunk layer, so fold w_feat @ w1 into a single (L, H)
        # matrix once, stored bf16 for the MXU.
        self.w_fused = (params["w_feat"] @ params["w1"]).astype(jnp.bfloat16)
        self.b1 = params["b1"]
        self.w2 = params["w2"]
        self.b2 = params["b2"]
        # Enrollment embedding is constant per model -> normalize once.
        self.xe_n = x_e / (jnp.linalg.norm(x_e, axis=-1, keepdims=True) + 1e-10)
        self.threshold = float(threshold)
        self.frame_len = L
        self.vad_t = None           # no VAD in this synthetic setup
        self.calibrator = None      # TODO(synk): calibrator submodule not modeled; skipped when None, as in PyTorch

    def forward(self, s_t):
        B, wav_len = s_t.shape
        L = self.frame_len
        T = wav_len // L
        # framing (non-overlapping) is pure reshape glue; hot path is in Pallas.
        # The PyTorch transpose(1,2) is absorbed into the time-major weights.
        frames = s_t[:, :T * L].reshape(B * T, L).astype(jnp.bfloat16)
        # trace-time constant: block-diagonal 1/T mean-pooling matrix (B, B*T)
        pool = jnp.kron(jnp.eye(B, dtype=jnp.float32),
                        jnp.full((1, T), 1.0 / T, dtype=jnp.float32))
        # vad_t is None -> VAD branch skipped
        return cosine_scoring_fused(frames, self.w_fused, self.b1, pool,
                                    self.w2, self.b2, self.xe_n,
                                    self.threshold, B)               # (B, 2)


# ----------------------------------------------------------------------------
# Pure-JAX references
# ----------------------------------------------------------------------------
def reference_forward_f32(s_t, params, x_e, threshold):
    """Unfused, full f32 — mirrors the original module structure."""
    B, wav_len = s_t.shape
    L = params["frame_len"]
    T = wav_len // L
    frames = s_t[:, :T * L].reshape(B, T, L)
    f_t = frames @ params["w_feat"]                                  # feat_extractor
    h = jnp.maximum(f_t @ params["w1"] + params["b1"][None], 0.0)    # trunk
    pooled = jnp.mean(h, axis=1)                                     # mean pooling
    emb = pooled @ params["w2"] + params["b2"]                       # embed head
    eps = 1e-10
    xt_n = emb / (jnp.linalg.norm(emb, axis=-1, keepdims=True) + eps)
    xe_n = x_e / (jnp.linalg.norm(x_e, axis=-1, keepdims=True) + eps)
    tar = jnp.sum(xe_n * xt_n, axis=-1, keepdims=True)
    non = threshold + 0.0 * tar
    return jnp.concatenate([non, tar], axis=-1)


def reference_forward_bf16(s_t, params, x_e, threshold):
    """Numerically matched to the kernel (fused bf16 matmul, f32 epilogue)."""
    B, wav_len = s_t.shape
    L = params["frame_len"]
    T = wav_len // L
    frames = s_t[:, :T * L].reshape(B * T, L).astype(jnp.bfloat16)
    w_fused = (params["w_feat"] @ params["w1"]).astype(jnp.bfloat16)
    h = jnp.maximum(
        jnp.dot(frames, w_fused, preferred_element_type=jnp.float32)
        + params["b1"], 0.0)
    pooled = h.reshape(B, T, -1).mean(axis=1)
    emb = pooled @ params["w2"] + params["b2"]
    eps = 1e-10
    xt_n = emb / (jnp.linalg.norm(emb, axis=-1, keepdims=True) + eps)
    xe_n = x_e / (jnp.linalg.norm(x_e, axis=-1, keepdims=True) + eps)
    tar = jnp.sum(xe_n * xt_n, axis=-1, keepdims=True)
    non = threshold + 0.0 * tar
    return jnp.concatenate([non, tar], axis=-1)


if __name__ == "__main__":
    # Small, deterministic configuration
    B = 2            # batch
    wav_len = 1024   # samples
    L = 64           # frame length (non-overlapping hop = L) -> T = 16 frames
    F = 32           # feature dim (disappears via w_feat @ w1 fusion)
    H = 128          # trunk hidden dim (lane-dense)
    E = 128          # embedding dim (lane-dense)

    key = jax.random.PRNGKey(0)
    k = jax.random.split(key, 7)
    params = dict(
        frame_len=L,
        w_feat=jax.random.normal(k[0], (L, F), jnp.float32) * 0.1,
        w1=jax.random.normal(k[1], (F, H), jnp.float32) * 0.1,   # time-major (F,H)
        b1=jax.random.normal(k[2], (1, H), jnp.float32) * 0.01,
        w2=jax.random.normal(k[3], (H, E), jnp.float32) * 0.1,   # time-major (H,E)
        b2=jax.random.normal(k[4], (1, E), jnp.float32) * 0.01,
    )
    x_e = jax.random.normal(k[5], (1, E), jnp.float32)        # enrollment embedding
    s_t = jax.random.normal(k[6], (B, wav_len), jnp.float32)  # input waveform

    model = MyModelPallas(params, x_e, threshold=0.0)
    score = jax.block_until_ready(model.forward(s_t))
    assert score.shape == (B, 2)

    # Strict check vs a bf16-matched reference (validates kernel plumbing).
    ref_strict = jax.block_until_ready(reference_forward_bf16(s_t, params, x_e, 0.0))
    assert jnp.max(jnp.abs(score - ref_strict)) < 5e-3, "mismatch vs bf16 reference"

    # Loose check vs the unfused full-f32 reference (validates the algebraic
    # w_feat@w1 fusion; bf16 MXU inputs shift only the last bits).
    ref_f32 = jax.block_until_ready(reference_forward_f32(s_t, params, x_e, 0.0))
    assert jnp.max(jnp.abs(score - ref_f32)) < 5e-2, "mismatch vs f32 reference"

    print("KERNEL_OK")
</pallas_src>

<mosaic_0001>
module attributes {stable_mosaic.version = 11 : i64} {
  func.func @fused_kernel(%arg0: memref<32x64xbf16, #tpu.memory_space<vmem>>, %arg1: memref<64x128xbf16, #tpu.memory_space<vmem>>, %arg2: memref<1x128xf32, #tpu.memory_space<vmem>>, %arg3: memref<2x32xf32, #tpu.memory_space<vmem>>, %arg4: memref<128x128xf32, #tpu.memory_space<vmem>>, %arg5: memref<1x128xf32, #tpu.memory_space<vmem>>, %arg6: memref<1x128xf32, #tpu.memory_space<vmem>>, %arg7: memref<2x2xf32, #tpu.memory_space<vmem>>) attributes {dimension_semantics = [], scalar_prefetch = 0 : i64, scratch_operands = 0 : i64, tpu.core_type = #tpu.core_type<tc>} {
    %c0 = arith.constant 0 : index
    %c0_0 = arith.constant 0 : index
    %0 = vector.load %arg0[%c0, %c0_0] : memref<32x64xbf16, #tpu.memory_space<vmem>>, vector<32x64xbf16>
    %c0_1 = arith.constant 0 : index
    %c0_2 = arith.constant 0 : index
    %1 = vector.load %arg1[%c0_1, %c0_2] : memref<64x128xbf16, #tpu.memory_space<vmem>>, vector<64x128xbf16>
    %cst = arith.constant dense<0.000000e+00> : vector<32x128xf32>
    %2 = tpu.matmul %0, %1, %cst {dimension_numbers = #tpu.dot_dimension_numbers<[1], [0], [0], [1], [0, 0, 1, 1], [], []>} : vector<32x64xbf16>, vector<64x128xbf16>, vector<32x128xf32> -> vector<32x128xf32>
    %c0_3 = arith.constant 0 : index
    %c0_4 = arith.constant 0 : index
    %3 = vector.load %arg2[%c0_3, %c0_4] : memref<1x128xf32, #tpu.memory_space<vmem>>, vector<1x128xf32>
    %4 = vector.broadcast %3 : vector<1x128xf32> to vector<32x128xf32>
    %5 = arith.addf %2, %4 : vector<32x128xf32>
    %cst_5 = arith.constant 0.000000e+00 : f32
    %6 = vector.broadcast %cst_5 : f32 to vector<32x128xf32>
    %7 = arith.maximumf %5, %6 : vector<32x128xf32>
    %c0_6 = arith.constant 0 : index
    %c0_7 = arith.constant 0 : index
    %8 = vector.load %arg3[%c0_6, %c0_7] : memref<2x32xf32, #tpu.memory_space<vmem>>, vector<2x32xf32>
    %cst_8 = arith.constant dense<0.000000e+00> : vector<2x128xf32>
    %9 = tpu.matmul %8, %7, %cst_8 {dimension_numbers = #tpu.dot_dimension_numbers<[1], [0], [0], [1], [0, 0, 1, 1], [], []>} : vector<2x32xf32>, vector<32x128xf32>, vector<2x128xf32> -> vector<2x128xf32>
    %c0_9 = arith.constant 0 : index
    %c0_10 = arith.constant 0 : index
    %10 = vector.load %arg4[%c0_9, %c0_10] : memref<128x128xf32, #tpu.memory_space<vmem>>, vector<128x128xf32>
    %cst_11 = arith.constant dense<0.000000e+00> : vector<2x128xf32>
    %11 = tpu.matmul %9, %10, %cst_11 {dimension_numbers = #tpu.dot_dimension_numbers<[1], [0], [0], [1], [0, 0, 1, 1], [], []>} : vector<2x128xf32>, vector<128x128xf32>, vector<2x128xf32> -> vector<2x128xf32>
    %c0_12 = arith.constant 0 : index
    %c0_13 = arith.constant 0 : index
    %12 = vector.load %arg5[%c0_12, %c0_13] : memref<1x128xf32, #tpu.memory_space<vmem>>, vector<1x128xf32>
    %13 = vector.broadcast %12 : vector<1x128xf32> to vector<2x128xf32>
    %14 = arith.addf %11, %13 : vector<2x128xf32>
    %15 = arith.mulf %14, %14 : vector<2x128xf32>
    %cst_14 = arith.constant dense<0.000000e+00> : vector<2xf32>
    %16 = vector.multi_reduction <add>, %15, %cst_14 [1] : vector<2x128xf32> to vector<2xf32>
    %17 = vector.shape_cast %16 : vector<2xf32> to vector<2x1xf32>
    %18 = math.sqrt %17 : vector<2x1xf32>
    %cst_15 = arith.constant 1.000000e-10 : f32
    %19 = vector.broadcast %cst_15 : f32 to vector<2x1xf32>
    %20 = arith.addf %18, %19 : vector<2x1xf32>
    %21 = tpu.reciprocal %20 {approx = true} : vector<2x1xf32> -> vector<2x1xf32>
    %22 = vector.broadcast %21 : vector<2x1xf32> to vector<2x128xf32>
    %23 = arith.mulf %14, %22 : vector<2x128xf32>
    %c0_16 = arith.constant 0 : index
    %c0_17 = arith.constant 0 : index
    %24 = vector.load %arg6[%c0_16, %c0_17] : memref<1x128xf32, #tpu.memory_space<vmem>>, vector<1x128xf32>
    %25 = vector.broadcast %24 : vector<1x128xf32> to vector<2x128xf32>
    %26 = arith.mulf %25, %23 : vector<2x128xf32>
    %cst_18 = arith.constant dense<0.000000e+00> : vector<2xf32>
    %27 = vector.multi_reduction <add>, %26, %cst_18 [1] : vector<2x128xf32> to vector<2xf32>
    %28 = vector.shape_cast %27 : vector<2xf32> to vector<2x1xf32>
    %cst_19 = arith.constant 0.000000e+00 : f32
    %29 = vector.broadcast %cst_19 : f32 to vector<2x1xf32>
    %30 = arith.mulf %29, %28 : vector<2x1xf32>
    %cst_20 = arith.constant 0.000000e+00 : f32
    %31 = vector.broadcast %cst_20 : f32 to vector<2x1xf32>
    %32 = arith.addf %31, %30 : vector<2x1xf32>
    %c0_21 = arith.constant 0 : index
    %c0_22 = arith.constant 0 : index
    %33 = vector.load %arg7[%c0_21, %c0_22] : memref<2x2xf32, #tpu.memory_space<vmem>>, vector<2x1xf32>
    tpu.vector_store %arg7[%c0_21, %c0_22], %32 {strides = array<i32>} : memref<2x2xf32, #tpu.memory_space<vmem>>, vector<2x1xf32>,
    %c0_23 = arith.constant 0 : index
    %c1 = arith.constant 1 : index
    %34 = vector.load %arg7[%c0_23, %c1] : memref<2x2xf32, #tpu.memory_space<vmem>>, vector<2x1xf32>
    tpu.vector_store %arg7[%c0_23, %c1], %28 {strides = array<i32>} : memref<2x2xf32, #tpu.memory_space<vmem>>, vector<2x1xf32>,
    return
  }
}

</mosaic_0001>

<bundles_post_ra>
// kernel: tpu_custom_call.1
= control target key start
LH: loop header
LB: loop body
LE: loop exit
PB: predicated region body
PF: predicated region fallthrough
CT: control target
= control target key end

     0   :  { %12 = vsyncpa [#allocation3], 0  ;;  %s700_s0 = inlined_call_operand.hbm [shape: bf16[32,64], index: 0, kind: input, shape index: {}]   ;;  %s701_s1 = inlined_call_operand.hbm [shape: bf16[64,128], index: 1, kind: input, shape index: {}]   ;;  %s702_s2 = inlined_call_operand.vmem [shape: f32[1,128], index: 2, kind: input, shape index: {}]   ;;  %s703_s3 = inlined_call_operand.vmem [shape: f32[2,32], index: 3, kind: input, shape index: {}]   ;;  %s704_s4 = inlined_call_operand.hbm [shape: f32[128,128], index: 4, kind: input, shape index: {}]   ;;  %s705_s5 = inlined_call_operand.vmem [shape: f32[1,128], index: 5, kind: input, shape index: {}]   ;;  %s706_s6 = inlined_call_operand.vmem [shape: f32[1,128], index: 6, kind: input, shape index: {}]   ;;  %s707_s7 = inlined_call_operand.hbm [shape: f32[2,2], index: 7, kind: output, shape index: {}]  }
   0x1   :  { %13 = vsyncpa [#allocation6], 0 }
   0x2   :  { %14 = vsyncpa [#allocation4], 0  ;;  %s602_s24 = smov [#allocation5]   ;;  %s603_s26 = smov [#allocation2]  }
   0x3   :  { %s32_s25 = sshll.u32 %s602_s24, 4  ;;  %s20_s27 = sshll.u32 %s603_s26, 4  ;;  %s33_s25 = int_to_ptr.vmem [resolvable:$true] %s32_s25  ;;  %s21_s27 = int_to_ptr.vmem [resolvable:$true] %s20_s27 }
   0x4   :  { %s524_s28 = scalar_lea.vmem %s33_s25, 512  ;;  %p529_p1 = scmp.lt.s32.totalorder %s33_s25, %s33_s25 }
   0x5   :  { %p525_p0 = scmp.ne.s32.totalorder %s33_s25, %s524_s28  ;;  %p530_p2 = scmp.lt.s32.totalorder %s524_s28, %s524_s28 }
   0x7   :  { %p531_p3 = por %p530_p2, %p529_p1 }
   0x9   :  { %p532_p4 = pnand %p531_p3, %p525_p0 }
   0xb   :  { %535 = shalt.err (!%p532_p4)
}
   0xc   :  { %s604_s29 = smov 64   ;;  %s605_s30 = smov 4  }
   0xd   :  { %38 = dma.hbm_to_vmem [thread:$0]  %s701_s1, 512, %s33_s25, [#allocation6], %s604_s29, %s604_s29, %s605_s30  }
   0xe   :  { %s544_s10 = scalar_lea.vmem %s21_s27, 256  ;;  %p549_p6 = scmp.lt.s32.totalorder %s21_s27, %s21_s27 }
   0xf   :  { %p545_p5 = scmp.ne.s32.totalorder %s21_s27, %s544_s10  ;;  %p550_p7 = scmp.lt.s32.totalorder %s544_s10, %s544_s10 }
  0x11   :  { %p551_p8 = por %p550_p7, %p549_p6 }
  0x13   :  { %p552_p9 = pnand %p551_p8, %p545_p5 }
  0x15   :  { %555 = shalt.err (!%p552_p9)
}
  0x16   :  { %26 = dma.hbm_to_vmem [thread:$0]  %s700_s0, 256, %s21_s27, [#allocation3], %s604_s29, %s604_s29, %s605_s30  }
  0x17   :  { %s606_s13 = smov [#allocation7]  }
  0x18   :  { %s48_s14 = sshll.u32 %s606_s13, 4  ;;  %s49_s14 = int_to_ptr.vmem [resolvable:$true] %s48_s14 }
  0x19   :  { %s564_s15 = scalar_lea.vmem %s49_s14, 2048  ;;  %p569_p11 = scmp.lt.s32.totalorder %s49_s14, %s49_s14 }
  0x1a   :  { %p565_p10 = scmp.ne.s32.totalorder %s49_s14, %s564_s15  ;;  %p570_p12 = scmp.lt.s32.totalorder %s564_s15, %s564_s15 }
  0x1c   :  { %p571_p13 = por %p570_p12, %p569_p11 }
  0x1e   :  { %p572_p0 = pnand %p571_p13, %p565_p10 }
  0x20   :  { %575 = shalt.err (!%p572_p0)
}
  0x21   :  { %s607_s1 = smov 128   ;;  %s608_s16 = smov 8  }
  0x22   :  { %54 = dma.hbm_to_vmem [thread:$0]  %s704_s4, 2048, %s49_s14, [#allocation6], %s607_s1, %s607_s1, %s608_s16  }
  0x23   :  { %596 = dma.done.wait [#allocation3], 256  }
  0x24   :  { %597 = vsyncadd [#allocation3], 4294967040 }
  0x25   :  { %598 = dma.done.wait [#allocation6], 2560  }
  0x26   :  { %599 = vsyncadd [#allocation6], 4294964736  ;;  %v506_v0 = vld [vmem:[#allocation5 + $0x18] sm:$0xff]   ;;  %v507_v1 = vld [vmem:[#allocation5 + $0x10] sm:$0xff]   ;;  %vm122_vm0 = vcmask 523264   ;;  %v609_v6 = vmov 0.0  }
  0x27   :  { %438 = vmatprep.subr.bf16.mxu0 %v506_v0  ;;  %v508_v2 = vld [vmem:[#allocation5 + $0x8] sm:$0xff]   ;;  %v510_v3 = vld [vmem:[#allocation2] sm:$0xff]   ;;  %v509_v4 = vld [vmem:[#allocation5] sm:$0xff]   ;;  %461 = vmatprep.subr.mxu1 %v609_v6  ;;  %vm610_vm1 = vmmov 0   ;;  %vm183_vm2 = vcmask 261120   ;;  %vm351_vm3 = vcmask 1041408  }
  0x28   :  { %439 = vmatpush3.bf16.msra.mxu0 %v506_v0  ;;  %446 = vmatprep.mubr.msk.bf16.mxu0 %vm122_vm0, %v510_v3  ;;  %v511_v5 = vld [vmem:[#allocation2 + $0x8] sm:$0xff]   ;;  %v271_v8 = vld [vmem:[#allocation7 + $0x70] sm:$0xff]  ;;  %v270_v9 = vld [vmem:[#allocation7 + $0x68] sm:$0xff]  ;;  %s611_s22 = smov [#allocation8]   ;;  %vm378_vm6 = vcmask 1024   ;;  %vm380_vm7 = vcmask 9224  }
  0x29   :  { %440 = vmatprep.subr.bf16.mxu0 %v507_v1  ;;  %493 = vmatprep.mubr.msk.f32.mxu1 %vm610_vm1, %v609_v6  ;;  %v272_v7 = vld [vmem:[#allocation7 + $0x78] sm:$0xff]  ;;  %v269_v10 = vld [vmem:[#allocation7 + $0x60] sm:$0xff]  ;;  %v267_v12 = vld [vmem:[#allocation7 + $0x50] sm:$0xff]  ;;  %s388_s23 = sshll.u32 %s611_s22, 4  ;;  %s389_s23 = int_to_ptr.vmem [resolvable:$true] %s388_s23 }
  0x2a   :  { %462 = vmatpush3.msra.mxu1 %v272_v7  ;;  %v268_v11 = vld [vmem:[#allocation7 + $0x58] sm:$0xff]  ;;  %v266_v13 = vld [vmem:[#allocation7 + $0x48] sm:$0xff]  ;;  %v265_v14 = vld [vmem:[#allocation7 + $0x40] sm:$0xff]  ;;  %s576_s24 = scalar_lea.vmem %s389_s23, 32  ;;  %p581_p2 = scmp.lt.s32.totalorder %s389_s23, %s389_s23 }
  0x2b   :  { %463 = vmatprep.subr.mxu1 %v609_v6  ;;  %v264_v15 = vld [vmem:[#allocation7 + $0x38] sm:$0xff]  ;;  %v263_v16 = vld [vmem:[#allocation7 + $0x30] sm:$0xff]  ;;  %v262_v17 = vld [vmem:[#allocation7 + $0x28] sm:$0xff]  ;;  %p577_p1 = scmp.ne.s32.totalorder %s389_s23, %s576_s24  ;;  %p582_p3 = scmp.lt.s32.totalorder %s576_s24, %s576_s24 }
  0x2c   :  { %441 = vmatpush3.bf16.msra.mxu0 %v507_v1  ;;  %464 = vmatpush3.msra.mxu1 %v271_v8  ;;  %v261_v18 = vld [vmem:[#allocation7 + $0x20] sm:$0xff]  ;;  %v260_v19 = vld [vmem:[#allocation7 + $0x18] sm:$0xff]  ;;  %v259_v20 = vld [vmem:[#allocation7 + $0x10] sm:$0xff] }
  0x2d   :  { %442 = vmatprep.subr.bf16.mxu0 %v508_v2  ;;  %465 = vmatprep.subr.mxu1 %v609_v6  ;;  %v258_v21 = vld [vmem:[#allocation7 + $0x8] sm:$0xff]  ;;  %v398_v23 = vld [vmem:[%s702_s2] ss:$0 sm:$0xff]  ;;  %v257_v36 = vld [vmem:[#allocation7] sm:$0xff]  ;;  %p583_p4 = por %p582_p3, %p581_p2 }
  0x2e   :  { %466 = vmatpush3.msra.mxu1 %v270_v9  ;;  %v182_v35 = vld [vmem:[%s703_s3] sm:$0x3] }
  0x2f   :  { %467 = vmatprep.subr.mxu1 %v609_v6  ;;  %v408_v39 = vld [vmem:[%s705_s5] ss:$0 sm:$0xff]  ;;  %p584_p5 = pnand %p583_p4, %p577_p1 }
  0x30   :  { %443 = vmatpush3.bf16.msra.mxu0 %v508_v2  ;;  %468 = vmatpush3.msra.mxu1 %v269_v10  ;;  %v409_v53 = vld [vmem:[%s706_s6] ss:$0 sm:$0xff] }
  0x31   :  { %444 = vmatprep.subr.bf16.mxu0 %v509_v4  ;;  %469 = vmatprep.subr.mxu1 %v609_v6 }
  0x32   :  { %470 = vmatpush3.msra.mxu1 %v268_v11 }
  0x33   :  { %471 = vmatprep.subr.mxu1 %v609_v6 }
  0x34   :  { %445 = vmatpush3.bf16.msra.mxu0 %v509_v4  ;;  %472 = vmatpush3.msra.mxu1 %v267_v12 }
  0x35   :  { %450 = vmatprep.subr.mxu0 %v609_v6  ;;  %473 = vmatprep.subr.mxu1 %v609_v6 }
  0x36   :  { %474 = vmatpush3.msra.mxu1 %v266_v13 }
  0x37   :  { %447 = vmatmul.mubr.msk.bf16.vlgmr.msra.gmra.mxu0 %vm122_vm0, %v511_v5  ;;  %475 = vmatprep.subr.mxu1 %v609_v6 }
  0x38   :  { %458 = vmatprep.mubr.msk.f32.mxu0 %vm610_vm1, %v609_v6  ;;  %476 = vmatpush3.msra.mxu1 %v265_v14 }
  0x39   :  { %477 = vmatprep.subr.mxu1 %v609_v6 }
  0x3a   :  { %478 = vmatpush3.msra.mxu1 %v264_v15 }
  0x3b   :  { %479 = vmatprep.subr.mxu1 %v609_v6 }
  0x3c   :  { %480 = vmatpush3.msra.mxu1 %v263_v16 }
  0x3d   :  { %481 = vmatprep.subr.mxu1 %v609_v6 }
  0x3e   :  { %482 = vmatpush3.msra.mxu1 %v262_v17 }
  0x3f   :  { %483 = vmatprep.subr.mxu1 %v609_v6 }
  0x40   :  { %484 = vmatpush3.msra.mxu1 %v261_v18 }
  0x41   :  { %485 = vmatprep.subr.mxu1 %v609_v6 }
  0x42   :  { %486 = vmatpush3.msra.mxu1 %v260_v19 }
  0x43   :  { %487 = vmatprep.subr.mxu1 %v609_v6 }
  0x44   :  { %488 = vmatpush3.msra.mxu1 %v259_v20 }
  0x45   :  { %489 = vmatprep.subr.mxu1 %v609_v6 }
  0x46   :  { %490 = vmatpush3.msra.mxu1 %v258_v21 }
  0x47   :  { %491 = vmatprep.subr.mxu1 %v609_v6 }
  0x48   :  { %492 = vmatpush3.msra.mxu1 %v257_v36 }
  0xf7   :  { %v448_v22 = vpop.f32.mrf.mxu0 }
  0xf8   :  { %v172_v26 = vadd.f32 %v448_v22, %v398_v23 }
  0xf9   :  { %v163_v24 = vpop.f32.mrf.mxu0 }
  0xfa   :  { %v180_v31 = vmax.f32 %v172_v26, 0.0  ;;  %v164_v32 = vadd.f32 %v398_v23, %v163_v24 }
  0xfb   :  { %v449_v25 = vpop.f32.mrf.mxu0 }
  0xfc   :  { %v175_v27 = vadd.f32 %v449_v25, %v398_v23  ;;  %v178_v34 = vmax.f32 %v164_v32, 0.0 }
  0xfd   :  { %v166_v28 = vpop.f32.mrf.mxu0 }
  0xfe   :  { %v181_v29 = vmax.f32 %v175_v27, 0.0  ;;  %v167_v30 = vadd.f32 %v398_v23, %v166_v28 }
 0x100   :  { %451 = vmatpush3.msra.mxu0 %v181_v29  ;;  %v179_v33 = vmax.f32 %v167_v30, 0.0 }
 0x101   :  { %452 = vmatprep.subr.mxu0 %v609_v6 }
 0x102   :  { %453 = vmatpush3.msra.mxu0 %v180_v31 }
 0x103   :  { %454 = vmatprep.subr.mxu0 %v609_v6 }
 0x104   :  { %455 = vmatpush3.msra.mxu0 %v179_v33 }
 0x105   :  { %456 = vmatprep.subr.mxu0 %v609_v6 }
 0x106   :  { %457 = vmatpush3.msra.mxu0 %v178_v34 }
 0x107   :  { %459 = vmatmul.mubr.msk.f32.vlgmr.msra.gmra.mxu0 %vm183_vm2, %v182_v35 }
 0x1c7   :  { %v253_v37 = vpop.f32.mrf.mxu0 }
 0x1c8   :  { %494 = vmatmul.mubr.f32.vlgmr.msra.gmra.mxu1 %v253_v37 }
 0x1c9   :  { %v460_v38 = vpop.f32.mrf.mxu0 }
 0x288   :  { %v346_v40 = vpop.f32.mrf.mxu1 }
 0x289   :  { %v347_v41 = vadd.f32 %v408_v39, %v346_v40 }
 0x28a   :  { %v495_v42 = vpop.f32.mrf.mxu1 }
 0x28b   :  { %v350_v43 = vmul.f32 %v347_v41, %v347_v41 }
 0x28d   :  { %v352_v44 = vsel %vm351_vm3, %v350_v43, 0.0 }
 0x28e   :  { %353 = vadd.xlane.f32.xlu0 %v352_v44 }
 0x317   :  { %v354_v45 = vpop.xlane.xlu0 %353 }
 0x318   :  { %512 = vrsqrt.f32 %v354_v45  ;;  %vm357_vm4 = vcmp.eq.f32.partialorder %v354_v45, inf  ;;  %v360_v48 = vand.u32 2147483648, %v354_v45  ;;  %vm359_vm5 = vcmp.eq.f32.partialorder %v354_v45, 0.0 }
 0x325   :  { %v513_v46 = vpop.eup %512 }
 0x326   :  { %v356_v47 = vmul.f32 %v513_v46, %v354_v45 }
 0x328   :  { %v358_v49 = vsel %vm357_vm4, %v354_v45, %v356_v47 }
 0x329   :  { %v361_v50 = vsel %vm359_vm5, %v360_v48, %v358_v49 }
 0x32a   :  { %v362_v51 = vadd.f32 1e-10, %v361_v50 }
 0x32c   :  { %514 = vrcp.f32 %v362_v51 }
 0x339   :  { %v515_v52 = vpop.eup %514 }
 0x33a   :  { %v364_v54 = vmul.f32 %v515_v52, %v347_v41 }
 0x33c   :  { %v372_v55 = vmul.f32 %v409_v53, %v364_v54 }
 0x33e   :  { %v373_v56 = vsel %vm351_vm3, %v372_v55, 0.0 }
 0x33f   :  { %374 = vadd.xlane.f32.xlu0 %v373_v56 }
 0x3c8   :  { %v375_v57 = vpop.xlane.xlu0 %374 }
 0x3c9   :  { %v376_v58 = vmul.f32 0.0, %v375_v57 }
 0x3cb   :  { %379 = vst.msk [vmem:[#allocation8] sm:$0x3] %vm378_vm6, %v376_v58 }
 0x3cc   :  { %381 = vst.msk [vmem:[#allocation8] sm:$0x3] %vm380_vm7, %v375_v57 }
 0x3cd   :  { %587 = shalt.err (!%p584_p5)
}
 0x3ce   :  { %391 = dma.vmem_to_hbm [thread:$0]  %s389_s23, 32, %s707_s7, [#allocation4]  }
 0x3cf   :  { %600 = dma.done.wait [#allocation4], 32  }
 0x3d0   :  { %601 = vsyncadd [#allocation4], 4294967264 }
 0x3d1   :  { %395 = vsyncpa [#allocation3], 1 }
 0x3d2   :  { %396 = vsyncpa [#allocation6], 1 }
 0x3d3   :  { %397 = vsyncpa [#allocation4], 1 }

</bundles_post_ra>
